<compile_context>
chip_gen: v5e
topology: v5e:2x2
jax: 0.10.0
libtpu: 0.0.40
codegen_flags: <defaults>
</compile_context>

<pallas_src>
import functools

import jax
import jax.numpy as jnp
from jax import lax
from jax.experimental import pallas as pl
from jax.experimental.pallas import tpu as pltpu

NUM_CLASSES = 3            # hard-coded in the PyTorch module
NUM_FG = NUM_CLASSES - 1   # background (class 0) dice is dropped by the loss
NUM_STATS = 3              # intersection, pred-sum, target-sum
EPSILON = 1e-6
_NEG_BIG = -1e9            # masked-out logit -> softmax prob exactly 0
_DEFAULT_CHUNK_PIXELS = 128 * 1024   # ~1.5 MiB f32 preds per grid step


def _cdiv(a, b):
    return -(-a // b)


def _make_dice_stats_kernel(H, th, W, ragged):
    """Build a kernel specialized on the static chunk geometry."""
    fold_rows = (th % 8 == 0)   # (th,W) -> (th//8,8,W) sublane fold is exact

    def kernel(preds_ref, targets_ref, out_ref, acc_ref):
        # preds_ref  : (1, C, th, W)             float (f32 or bf16)
        # targets_ref: (1, th, W)                int
        # out_ref    : (1, NUM_FG, NUM_STATS)    f32
        # acc_ref    : (NUM_FG*NUM_STATS, 8, W)  f32 running-sum tiles
        k = pl.program_id(1)
        last = pl.num_programs(1) - 1

        @pl.when(k == 0)
        def _init():
            acc_ref[...] = jnp.zeros(acc_ref.shape, acc_ref.dtype)

        def _accumulate(i, x):
            # Deferred reduction: per chunk only vreg adds into an (8, W)
            # running-sum tile; the cross-sublane/lane collapse happens once,
            # in the finalize step.
            if fold_rows:
                acc_ref[i] += jnp.sum(x.reshape(th // 8, 8, W), axis=0)
            else:   # tiny-image corner case (th == H, H % 8 != 0)
                acc_ref[i, 0:1, 0:1] += jnp.sum(x).reshape(1, 1)

        def _process(masked):
            p0 = preds_ref[0, 0].astype(jnp.float32)
            p1 = preds_ref[0, 1].astype(jnp.float32)
            p2 = preds_ref[0, 2].astype(jnp.float32)
            t = targets_ref[0]
            if masked:
                # Ragged H tail: neutralize out-of-bounds rows BEFORE exp so
                # garbage can never become NaN/Inf; masked pixels put all
                # softmax mass on class 0 with target 0 -> exactly zero
                # contribution to every accumulated foreground statistic.
                row = lax.broadcasted_iota(jnp.int32, (th, W), 0)
                valid = (k * th + row) < H
                p0 = jnp.where(valid, p0, 0.0)
                p1 = jnp.where(valid, p1, _NEG_BIG)
                p2 = jnp.where(valid, p2, _NEG_BIG)
                t = jnp.where(valid, t, 0)

            # numerically stable softmax over the 3 classes, fully unrolled
            # (pure elementwise VPU work; exp/reciprocal on the EUP slot).
            m = jnp.maximum(p0, jnp.maximum(p1, p2))
            e0 = jnp.exp(p0 - m)
            e1 = jnp.exp(p1 - m)
            e2 = jnp.exp(p2 - m)
            d = e0 + e1 + e2
            inv = pl.reciprocal(d, approx=True)
            inv = inv * (2.0 - d * inv)           # one Newton step -> ~exact
            sm1 = e1 * inv                        # class-0 prob never needed
            sm2 = e2 * inv

            is1 = t == 1
            is2 = t == 2
            _accumulate(0, jnp.where(is1, sm1, 0.0))   # intersection, class 1
            _accumulate(1, sm1)                        # pred sum,     class 1
            _accumulate(2, jnp.where(is1, 1.0, 0.0))   # target sum,   class 1
            _accumulate(3, jnp.where(is2, sm2, 0.0))   # intersection, class 2
            _accumulate(4, sm2)                        # pred sum,     class 2
            _accumulate(5, jnp.where(is2, 1.0, 0.0))   # target sum,   class 2

        if ragged:
            # Only the last spatial chunk pays for the tail mask.
            @pl.when(k != last)
            def _interior():
                _process(masked=False)

            @pl.when(k == last)
            def _tail():
                _process(masked=True)
        else:
            _process(masked=False)

        @pl.when(k == last)
        def _finalize():
            for i in range(NUM_FG * NUM_STATS):
                r, c = divmod(i, NUM_STATS)
                out_ref[0, r:r + 1, c:c + 1] = jnp.sum(acc_ref[i]).reshape(1, 1)

    return kernel


def dice_loss_class_reduction(preds, targets, epsilon=EPSILON,
                              chunk_pixels=_DEFAULT_CHUNK_PIXELS):
    """preds: (B, 3, H, W) float; targets: (B, H, W) int in [0, 3)."""
    B, C, H, W = preds.shape
    assert C == NUM_CLASSES, "module hard-codes 3 classes"

    # Keep incoming dtypes (bf16 preds stay bf16 in HBM and are upcast inside
    # the kernel; integer targets of any width are fine) -> no extra HBM copy.
    if preds.dtype not in (jnp.float32, jnp.bfloat16):
        preds = preds.astype(jnp.float32)
    if not jnp.issubdtype(targets.dtype, jnp.integer):
        targets = targets.astype(jnp.int32)

    # Spatial chunk along H: a multiple of 32 rows so packed target dtypes
    # (int8/int16) also keep a legal sublane tiling; small images use the
    # full-H block.  No padding is ever manufactured.
    th = max(32, (chunk_pixels // max(W, 1)) // 32 * 32)
    if th >= H:
        th, n_chunks, ragged = H, 1, False
    else:
        n_chunks = _cdiv(H, th)
        ragged = (H % th) != 0

    # TODO(synk): for tiny H*W with large B, fold several batch items into one
    # grid step to amortize the ~0.35us fixed per-step cost.
    # TODO(synk): on v7x with B == 1, additionally split H across the two
    # TensorCores (grid axis 0 is the only "parallel" axis here).
    kernel = _make_dice_stats_kernel(H, th, W, ragged)

    stats = pl.pallas_call(
        kernel,
        out_shape=jax.ShapeDtypeStruct((B, NUM_FG, NUM_STATS), jnp.float32),
        grid_spec=pltpu.PrefetchScalarGridSpec(
            num_scalar_prefetch=0,
            grid=(B, n_chunks),
            in_specs=[
                pl.BlockSpec((1, C, th, W), lambda b, k: (b, 0, k, 0)),
                pl.BlockSpec((1, th, W), lambda b, k: (b, k, 0)),
            ],
            out_specs=pl.BlockSpec((1, NUM_FG, NUM_STATS),
                                   lambda b, k: (b, 0, 0)),
            scratch_shapes=[
                pltpu.VMEM((NUM_FG * NUM_STATS, 8, W), jnp.float32)],
        ),
        compiler_params=pltpu.CompilerParams(
            dimension_semantics=("parallel", "arbitrary"),
            vmem_limit_bytes=32 * 1024 * 1024),
    )(preds, targets)

    inter = stats[:, :, 0]
    psum = stats[:, :, 1]
    tsum = stats[:, :, 2]

    # tiny (B x 2) glue math -- matches the PyTorch reference exactly.
    fg_exists = (tsum > 0).astype(jnp.float32)
    dice = (2.0 * inter + epsilon) / (psum + tsum + epsilon)
    fg_loss = 1.0 - dice
    fg_sum = jnp.sum(fg_loss * fg_exists, axis=0)
    fg_count = jnp.sum(fg_exists, axis=0)
    valid = fg_count > 0
    fg_mean = jnp.where(valid, fg_sum / jnp.where(valid, fg_count, 1.0), 0.0)
    num_valid = jnp.sum(valid.astype(jnp.float32))
    return jnp.where(num_valid > 0,
                     jnp.sum(fg_mean) / jnp.maximum(num_valid, 1.0),
                     jnp.float32(0.0))


def _reference_dice_loss(preds, targets, epsilon=EPSILON):
    """Pure-JAX mirror of the PyTorch module, for correctness checking."""
    B, C, H, W = preds.shape
    sm = jax.nn.softmax(preds.astype(jnp.float32), axis=1).reshape(B, C, H * W)
    t = targets.reshape(B, H * W)
    onehot = jax.nn.one_hot(t, C, axis=1, dtype=jnp.float32)   # (B, C, HW)
    class_exists = (onehot.sum(axis=2) > 0).astype(jnp.float32)
    inter = (sm * onehot).sum(axis=2)
    union = sm.sum(axis=2) + onehot.sum(axis=2)
    dice = (2.0 * inter + epsilon) / (union + epsilon)
    dice_loss = 1.0 - dice
    fg_loss, fg_exists = dice_loss[:, 1:], class_exists[:, 1:]
    fg_sum = (fg_loss * fg_exists).sum(axis=0)
    fg_count = fg_exists.sum(axis=0)
    valid = fg_count > 0
    fg_mean = jnp.where(valid, fg_sum / jnp.where(valid, fg_count, 1.0), 0.0)
    num_valid = valid.sum()
    return jnp.where(num_valid > 0,
                     fg_mean.sum() / jnp.maximum(num_valid, 1), 0.0)


if __name__ == "__main__":
    key = jax.random.PRNGKey(0)
    k1, k2, k3, k4 = jax.random.split(key, 4)

    # 1) small aligned case (single full-H chunk per batch item).
    B, C, H, W = 2, NUM_CLASSES, 16, 16
    preds = jax.random.normal(k1, (B, C, H, W), dtype=jnp.float32)
    targets = jax.random.randint(k2, (B, H, W), 0, NUM_CLASSES, dtype=jnp.int32)
    loss = jax.block_until_ready(jax.jit(dice_loss_class_reduction)(preds, targets))
    ref = _reference_dice_loss(preds, targets)
    assert loss.shape == () and bool(jnp.isfinite(loss))
    assert abs(float(loss) - float(ref)) < 1e-4, (float(loss), float(ref))

    # 2) ragged multi-chunk case (exercises the in-kernel tail mask and the
    #    pl.when-gated masked path) with bf16 logits streamed natively.
    B2, H2, W2 = 2, 40, 16
    preds2 = jax.random.normal(k3, (B2, NUM_CLASSES, H2, W2),
                               dtype=jnp.float32).astype(jnp.bfloat16)
    targets2 = jax.random.randint(k4, (B2, H2, W2), 0, NUM_CLASSES,
                                  dtype=jnp.int32)
    small_chunk = jax.jit(functools.partial(dice_loss_class_reduction,
                                            chunk_pixels=512))
    loss2 = jax.block_until_ready(small_chunk(preds2, targets2))
    ref2 = _reference_dice_loss(preds2, targets2)
    assert abs(float(loss2) - float(ref2)) < 1e-4, (float(loss2), float(ref2))

    print("KERNEL_OK")
</pallas_src>

<mosaic_0001>
module attributes {stable_mosaic.version = 11 : i64} {
  func.func @kernel(%arg0: i32, %arg1: i32, %arg2: memref<1x3x16x16xf32, #tpu.memory_space<vmem>>, %arg3: memref<1x16x16xi32, #tpu.memory_space<vmem>>, %arg4: memref<1x2x3xf32, #tpu.memory_space<vmem>>, %arg5: memref<6x8x16xf32, #tpu.memory_space<vmem>>) attributes {dimension_semantics = [#tpu.dimension_semantics<parallel>, #tpu.dimension_semantics<arbitrary>], iteration_bounds = array<i64: 2, 1>, scalar_prefetch = 0 : i64, scratch_operands = 1 : i64, tpu.core_type = #tpu.core_type<tc>, window_params = [{transform_indices = @transform_0, window_bounds = array<i64: 1, 3, 16, 16>}, {transform_indices = @transform_1, window_bounds = array<i64: 1, 16, 16>}, {transform_indices = @transform_2, window_bounds = array<i64: 1, 2, 3>}]} {
    %c0_i32 = arith.constant 0 : i32
    %0 = arith.cmpi eq, %arg1, %c0_i32 : i32
    %1 = arith.extui %0 : i1 to i32
    %c0_i32_0 = arith.constant 0 : i32
    %2 = arith.cmpi ne, %1, %c0_i32_0 : i32
    scf.if %2 {
      %cst_60 = arith.constant 0.000000e+00 : f32
      %93 = vector.broadcast %cst_60 : f32 to vector<6x8x16xf32>
      %c0_61 = arith.constant 0 : index
      %c0_62 = arith.constant 0 : index
      %c0_63 = arith.constant 0 : index
      %94 = vector.load %arg5[%c0_61, %c0_62, %c0_63] : memref<6x8x16xf32, #tpu.memory_space<vmem>>, vector<6x8x16xf32>
      tpu.vector_store %arg5[%c0_61, %c0_62, %c0_63], %93 {strides = array<i32>} : memref<6x8x16xf32, #tpu.memory_space<vmem>>, vector<6x8x16xf32>,
    } else {
    }
    %c0 = arith.constant 0 : index
    %c0_1 = arith.constant 0 : index
    %c0_2 = arith.constant 0 : index
    %c0_3 = arith.constant 0 : index
    %3 = vector.load %arg2[%c0, %c0_1, %c0_2, %c0_3] : memref<1x3x16x16xf32, #tpu.memory_space<vmem>>, vector<1x1x16x16xf32>
    %4 = vector.shape_cast %3 : vector<1x1x16x16xf32> to vector<16x16xf32>
    %c0_4 = arith.constant 0 : index
    %c1 = arith.constant 1 : index
    %c0_5 = arith.constant 0 : index
    %c0_6 = arith.constant 0 : index
    %5 = vector.load %arg2[%c0_4, %c1, %c0_5, %c0_6] : memref<1x3x16x16xf32, #tpu.memory_space<vmem>>, vector<1x1x16x16xf32>
    %6 = vector.shape_cast %5 : vector<1x1x16x16xf32> to vector<16x16xf32>
    %c0_7 = arith.constant 0 : index
    %c2 = arith.constant 2 : index
    %c0_8 = arith.constant 0 : index
    %c0_9 = arith.constant 0 : index
    %7 = vector.load %arg2[%c0_7, %c2, %c0_8, %c0_9] : memref<1x3x16x16xf32, #tpu.memory_space<vmem>>, vector<1x1x16x16xf32>
    %8 = vector.shape_cast %7 : vector<1x1x16x16xf32> to vector<16x16xf32>
    %c0_10 = arith.constant 0 : index
    %c0_11 = arith.constant 0 : index
    %c0_12 = arith.constant 0 : index
    %9 = vector.load %arg3[%c0_10, %c0_11, %c0_12] : memref<1x16x16xi32, #tpu.memory_space<vmem>>, vector<1x16x16xi32>
    %10 = vector.shape_cast %9 : vector<1x16x16xi32> to vector<16x16xi32>
    %11 = arith.maximumf %6, %8 : vector<16x16xf32>
    %12 = arith.maximumf %4, %11 : vector<16x16xf32>
    %13 = arith.subf %4, %12 : vector<16x16xf32>
    %14 = math.exp %13 : vector<16x16xf32>
    %15 = arith.subf %6, %12 : vector<16x16xf32>
    %16 = math.exp %15 : vector<16x16xf32>
    %17 = arith.subf %8, %12 : vector<16x16xf32>
    %18 = math.exp %17 : vector<16x16xf32>
    %19 = arith.addf %14, %16 : vector<16x16xf32>
    %20 = arith.addf %19, %18 : vector<16x16xf32>
    %21 = tpu.reciprocal %20 {approx = true} : vector<16x16xf32> -> vector<16x16xf32>
    %22 = arith.mulf %20, %21 : vector<16x16xf32>
    %cst = arith.constant 2.000000e+00 : f32
    %23 = vector.broadcast %cst : f32 to vector<16x16xf32>
    %24 = arith.subf %23, %22 : vector<16x16xf32>
    %25 = arith.mulf %21, %24 : vector<16x16xf32>
    %26 = arith.mulf %16, %25 : vector<16x16xf32>
    %27 = arith.mulf %18, %25 : vector<16x16xf32>
    %c1_i32 = arith.constant 1 : i32
    %28 = vector.broadcast %c1_i32 : i32 to vector<16x16xi32>
    %29 = arith.cmpi eq, %10, %28 : vector<16x16xi32>
    %c2_i32 = arith.constant 2 : i32
    %30 = vector.broadcast %c2_i32 : i32 to vector<16x16xi32>
    %31 = arith.cmpi eq, %10, %30 : vector<16x16xi32>
    %cst_13 = arith.constant 0.000000e+00 : f32
    %32 = vector.broadcast %cst_13 : f32 to vector<16x16xf32>
    %33 = arith.select %29, %26, %32 : vector<16x16xi1>, vector<16x16xf32>
    %c0_14 = arith.constant 0 : index
    %c0_15 = arith.constant 0 : index
    %c0_16 = arith.constant 0 : index
    %34 = vector.load %arg5[%c0_14, %c0_15, %c0_16] : memref<6x8x16xf32, #tpu.memory_space<vmem>>, vector<1x8x16xf32>
    %35 = vector.shape_cast %34 : vector<1x8x16xf32> to vector<8x16xf32>
    %36 = vector.shape_cast %33 : vector<16x16xf32> to vector<2x8x16xf32>
    %cst_17 = arith.constant dense<0.000000e+00> : vector<8x16xf32>
    %37 = vector.multi_reduction <add>, %36, %cst_17 [0] : vector<2x8x16xf32> to vector<8x16xf32>
    %38 = arith.addf %35, %37 : vector<8x16xf32>
    %c0_18 = arith.constant 0 : index
    %c0_19 = arith.constant 0 : index
    %c0_20 = arith.constant 0 : index
    %39 = vector.load %arg5[%c0_18, %c0_19, %c0_20] : memref<6x8x16xf32, #tpu.memory_space<vmem>>, vector<1x8x16xf32>
    %40 = vector.shape_cast %39 : vector<1x8x16xf32> to vector<8x16xf32>
    %41 = vector.shape_cast %38 : vector<8x16xf32> to vector<1x8x16xf32>
    tpu.vector_store %arg5[%c0_18, %c0_19, %c0_20], %41 {strides = array<i32>} : memref<6x8x16xf32, #tpu.memory_space<vmem>>, vector<1x8x16xf32>,
    %c1_21 = arith.constant 1 : index
    %c0_22 = arith.constant 0 : index
    %c0_23 = arith.constant 0 : index
    %42 = vector.load %arg5[%c1_21, %c0_22, %c0_23] : memref<6x8x16xf32, #tpu.memory_space<vmem>>, vector<1x8x16xf32>
    %43 = vector.shape_cast %42 : vector<1x8x16xf32> to vector<8x16xf32>
    %44 = vector.shape_cast %26 : vector<16x16xf32> to vector<2x8x16xf32>
    %cst_24 = arith.constant dense<0.000000e+00> : vector<8x16xf32>
    %45 = vector.multi_reduction <add>, %44, %cst_24 [0] : vector<2x8x16xf32> to vector<8x16xf32>
    %46 = arith.addf %43, %45 : vector<8x16xf32>
    %c1_25 = arith.constant 1 : index
    %c0_26 = arith.constant 0 : index
    %c0_27 = arith.constant 0 : index
    %47 = vector.load %arg5[%c1_25, %c0_26, %c0_27] : memref<6x8x16xf32, #tpu.memory_space<vmem>>, vector<1x8x16xf32>
    %48 = vector.shape_cast %47 : vector<1x8x16xf32> to vector<8x16xf32>
    %49 = vector.shape_cast %46 : vector<8x16xf32> to vector<1x8x16xf32>
    tpu.vector_store %arg5[%c1_25, %c0_26, %c0_27], %49 {strides = array<i32>} : memref<6x8x16xf32, #tpu.memory_space<vmem>>, vector<1x8x16xf32>,
    %cst_28 = arith.constant 1.000000e+00 : f32
    %cst_29 = arith.constant 0.000000e+00 : f32
    %50 = vector.broadcast %cst_28 : f32 to vector<16x16xf32>
    %51 = vector.broadcast %cst_29 : f32 to vector<16x16xf32>
    %52 = arith.select %29, %50, %51 : vector<16x16xi1>, vector<16x16xf32>
    %c2_30 = arith.constant 2 : index
    %c0_31 = arith.constant 0 : index
    %c0_32 = arith.constant 0 : index
    %53 = vector.load %arg5[%c2_30, %c0_31, %c0_32] : memref<6x8x16xf32, #tpu.memory_space<vmem>>, vector<1x8x16xf32>
    %54 = vector.shape_cast %53 : vector<1x8x16xf32> to vector<8x16xf32>
    %55 = vector.shape_cast %52 : vector<16x16xf32> to vector<2x8x16xf32>
    %cst_33 = arith.constant dense<0.000000e+00> : vector<8x16xf32>
    %56 = vector.multi_reduction <add>, %55, %cst_33 [0] : vector<2x8x16xf32> to vector<8x16xf32>
    %57 = arith.addf %54, %56 : vector<8x16xf32>
    %c2_34 = arith.constant 2 : index
    %c0_35 = arith.constant 0 : index
    %c0_36 = arith.constant 0 : index
    %58 = vector.load %arg5[%c2_34, %c0_35, %c0_36] : memref<6x8x16xf32, #tpu.memory_space<vmem>>, vector<1x8x16xf32>
    %59 = vector.shape_cast %58 : vector<1x8x16xf32> to vector<8x16xf32>
    %60 = vector.shape_cast %57 : vector<8x16xf32> to vector<1x8x16xf32>
    tpu.vector_store %arg5[%c2_34, %c0_35, %c0_36], %60 {strides = array<i32>} : memref<6x8x16xf32, #tpu.memory_space<vmem>>, vector<1x8x16xf32>,
    %cst_37 = arith.constant 0.000000e+00 : f32
    %61 = vector.broadcast %cst_37 : f32 to vector<16x16xf32>
    %62 = arith.select %31, %27, %61 : vector<16x16xi1>, vector<16x16xf32>
    %c3 = arith.constant 3 : index
    %c0_38 = arith.constant 0 : index
    %c0_39 = arith.constant 0 : index
    %63 = vector.load %arg5[%c3, %c0_38, %c0_39] : memref<6x8x16xf32, #tpu.memory_space<vmem>>, vector<1x8x16xf32>
    %64 = vector.shape_cast %63 : vector<1x8x16xf32> to vector<8x16xf32>
    %65 = vector.shape_cast %62 : vector<16x16xf32> to vector<2x8x16xf32>
    %cst_40 = arith.constant dense<0.000000e+00> : vector<8x16xf32>
    %66 = vector.multi_reduction <add>, %65, %cst_40 [0] : vector<2x8x16xf32> to vector<8x16xf32>
    %67 = arith.addf %64, %66 : vector<8x16xf32>
    %c3_41 = arith.constant 3 : index
    %c0_42 = arith.constant 0 : index
    %c0_43 = arith.constant 0 : index
    %68 = vector.load %arg5[%c3_41, %c0_42, %c0_43] : memref<6x8x16xf32, #tpu.memory_space<vmem>>, vector<1x8x16xf32>
    %69 = vector.shape_cast %68 : vector<1x8x16xf32> to vector<8x16xf32>
    %70 = vector.shape_cast %67 : vector<8x16xf32> to vector<1x8x16xf32>
    tpu.vector_store %arg5[%c3_41, %c0_42, %c0_43], %70 {strides = array<i32>} : memref<6x8x16xf32, #tpu.memory_space<vmem>>, vector<1x8x16xf32>,
    %c4 = arith.constant 4 : index
    %c0_44 = arith.constant 0 : index
    %c0_45 = arith.constant 0 : index
    %71 = vector.load %arg5[%c4, %c0_44, %c0_45] : memref<6x8x16xf32, #tpu.memory_space<vmem>>, vector<1x8x16xf32>
    %72 = vector.shape_cast %71 : vector<1x8x16xf32> to vector<8x16xf32>
    %73 = vector.shape_cast %27 : vector<16x16xf32> to vector<2x8x16xf32>
    %cst_46 = arith.constant dense<0.000000e+00> : vector<8x16xf32>
    %74 = vector.multi_reduction <add>, %73, %cst_46 [0] : vector<2x8x16xf32> to vector<8x16xf32>
    %75 = arith.addf %72, %74 : vector<8x16xf32>
    %c4_47 = arith.constant 4 : index
    %c0_48 = arith.constant 0 : index
    %c0_49 = arith.constant 0 : index
    %76 = vector.load %arg5[%c4_47, %c0_48, %c0_49] : memref<6x8x16xf32, #tpu.memory_space<vmem>>, vector<1x8x16xf32>
    %77 = vector.shape_cast %76 : vector<1x8x16xf32> to vector<8x16xf32>
    %78 = vector.shape_cast %75 : vector<8x16xf32> to vector<1x8x16xf32>
    tpu.vector_store %arg5[%c4_47, %c0_48, %c0_49], %78 {strides = array<i32>} : memref<6x8x16xf32, #tpu.memory_space<vmem>>, vector<1x8x16xf32>,
    %cst_50 = arith.constant 1.000000e+00 : f32
    %cst_51 = arith.constant 0.000000e+00 : f32
    %79 = vector.broadcast %cst_50 : f32 to vector<16x16xf32>
    %80 = vector.broadcast %cst_51 : f32 to vector<16x16xf32>
    %81 = arith.select %31, %79, %80 : vector<16x16xi1>, vector<16x16xf32>
    %c5 = arith.constant 5 : index
    %c0_52 = arith.constant 0 : index
    %c0_53 = arith.constant 0 : index
    %82 = vector.load %arg5[%c5, %c0_52, %c0_53] : memref<6x8x16xf32, #tpu.memory_space<vmem>>, vector<1x8x16xf32>
    %83 = vector.shape_cast %82 : vector<1x8x16xf32> to vector<8x16xf32>
    %84 = vector.shape_cast %81 : vector<16x16xf32> to vector<2x8x16xf32>
    %cst_54 = arith.constant dense<0.000000e+00> : vector<8x16xf32>
    %85 = vector.multi_reduction <add>, %84, %cst_54 [0] : vector<2x8x16xf32> to vector<8x16xf32>
    %86 = arith.addf %83, %85 : vector<8x16xf32>
    %c5_55 = arith.constant 5 : index
    %c0_56 = arith.constant 0 : index
    %c0_57 = arith.constant 0 : index
    %87 = vector.load %arg5[%c5_55, %c0_56, %c0_57] : memref<6x8x16xf32, #tpu.memory_space<vmem>>, vector<1x8x16xf32>
    %88 = vector.shape_cast %87 : vector<1x8x16xf32> to vector<8x16xf32>
    %89 = vector.shape_cast %86 : vector<8x16xf32> to vector<1x8x16xf32>
    tpu.vector_store %arg5[%c5_55, %c0_56, %c0_57], %89 {strides = array<i32>} : memref<6x8x16xf32, #tpu.memory_space<vmem>>, vector<1x8x16xf32>,
    %c0_i32_58 = arith.constant 0 : i32
    %90 = arith.cmpi eq, %arg1, %c0_i32_58 : i32
    %91 = arith.extui %90 : i1 to i32
    %c0_i32_59 = arith.constant 0 : i32
    %92 = arith.cmpi ne, %91, %c0_i32_59 : i32
    scf.if %92 {
      %c0_60 = arith.constant 0 : index
      %c0_61 = arith.constant 0 : index
      %c0_62 = arith.constant 0 : index
      %93 = vector.load %arg5[%c0_60, %c0_61, %c0_62] : memref<6x8x16xf32, #tpu.memory_space<vmem>>, vector<1x8x16xf32>
      %94 = vector.shape_cast %93 : vector<1x8x16xf32> to vector<8x16xf32>
      %95 = vector.shape_cast %94 : vector<8x16xf32> to vector<1x8x16xf32>
      %cst_63 = arith.constant dense<0.000000e+00> : vector<1xf32>
      %96 = vector.multi_reduction <add>, %95, %cst_63 [1, 2] : vector<1x8x16xf32> to vector<1xf32>
      %97 = vector.shape_cast %96 : vector<1xf32> to vector<1x1x1xf32>
      %98 = vector.extract %97[0, 0, 0] : f32 from vector<1x1x1xf32>
      %99 = vector.broadcast %98 : f32 to vector<1x1xf32>
      %c0_64 = arith.constant 0 : index
      %c0_65 = arith.constant 0 : index
      %c0_66 = arith.constant 0 : index
      %100 = vector.load %arg4[%c0_64, %c0_65, %c0_66] : memref<1x2x3xf32, #tpu.memory_space<vmem>>, vector<1x1x1xf32>
      %101 = vector.shape_cast %100 : vector<1x1x1xf32> to vector<1x1xf32>
      %102 = vector.shape_cast %99 : vector<1x1xf32> to vector<1x1x1xf32>
      tpu.vector_store %arg4[%c0_64, %c0_65, %c0_66], %102 {strides = array<i32>} : memref<1x2x3xf32, #tpu.memory_space<vmem>>, vector<1x1x1xf32>,
      %c1_67 = arith.constant 1 : index
      %c0_68 = arith.constant 0 : index
      %c0_69 = arith.constant 0 : index
      %103 = vector.load %arg5[%c1_67, %c0_68, %c0_69] : memref<6x8x16xf32, #tpu.memory_space<vmem>>, vector<1x8x16xf32>
      %104 = vector.shape_cast %103 : vector<1x8x16xf32> to vector<8x16xf32>
      %105 = vector.shape_cast %104 : vector<8x16xf32> to vector<1x8x16xf32>
      %cst_70 = arith.constant dense<0.000000e+00> : vector<1xf32>
      %106 = vector.multi_reduction <add>, %105, %cst_70 [1, 2] : vector<1x8x16xf32> to vector<1xf32>
      %107 = vector.shape_cast %106 : vector<1xf32> to vector<1x1x1xf32>
      %108 = vector.extract %107[0, 0, 0] : f32 from vector<1x1x1xf32>
      %109 = vector.broadcast %108 : f32 to vector<1x1xf32>
      %c0_71 = arith.constant 0 : index
      %c0_72 = arith.constant 0 : index
      %c1_73 = arith.constant 1 : index
      %110 = vector.load %arg4[%c0_71, %c0_72, %c1_73] : memref<1x2x3xf32, #tpu.memory_space<vmem>>, vector<1x1x1xf32>
      %111 = vector.shape_cast %110 : vector<1x1x1xf32> to vector<1x1xf32>
      %112 = vector.shape_cast %109 : vector<1x1xf32> to vector<1x1x1xf32>
      tpu.vector_store %arg4[%c0_71, %c0_72, %c1_73], %112 {strides = array<i32>} : memref<1x2x3xf32, #tpu.memory_space<vmem>>, vector<1x1x1xf32>,
      %c2_74 = arith.constant 2 : index
      %c0_75 = arith.constant 0 : index
      %c0_76 = arith.constant 0 : index
      %113 = vector.load %arg5[%c2_74, %c0_75, %c0_76] : memref<6x8x16xf32, #tpu.memory_space<vmem>>, vector<1x8x16xf32>
      %114 = vector.shape_cast %113 : vector<1x8x16xf32> to vector<8x16xf32>
      %115 = vector.shape_cast %114 : vector<8x16xf32> to vector<1x8x16xf32>
      %cst_77 = arith.constant dense<0.000000e+00> : vector<1xf32>
      %116 = vector.multi_reduction <add>, %115, %cst_77 [1, 2] : vector<1x8x16xf32> to vector<1xf32>
      %117 = vector.shape_cast %116 : vector<1xf32> to vector<1x1x1xf32>
      %118 = vector.extract %117[0, 0, 0] : f32 from vector<1x1x1xf32>
      %119 = vector.broadcast %118 : f32 to vector<1x1xf32>
      %c0_78 = arith.constant 0 : index
      %c0_79 = arith.constant 0 : index
      %c2_80 = arith.constant 2 : index
      %120 = vector.load %arg4[%c0_78, %c0_79, %c2_80] : memref<1x2x3xf32, #tpu.memory_space<vmem>>, vector<1x1x1xf32>
      %121 = vector.shape_cast %120 : vector<1x1x1xf32> to vector<1x1xf32>
      %122 = vector.shape_cast %119 : vector<1x1xf32> to vector<1x1x1xf32>
      tpu.vector_store %arg4[%c0_78, %c0_79, %c2_80], %122 {strides = array<i32>} : memref<1x2x3xf32, #tpu.memory_space<vmem>>, vector<1x1x1xf32>,
      %c3_81 = arith.constant 3 : index
      %c0_82 = arith.constant 0 : index
      %c0_83 = arith.constant 0 : index
      %123 = vector.load %arg5[%c3_81, %c0_82, %c0_83] : memref<6x8x16xf32, #tpu.memory_space<vmem>>, vector<1x8x16xf32>
      %124 = vector.shape_cast %123 : vector<1x8x16xf32> to vector<8x16xf32>
      %125 = vector.shape_cast %124 : vector<8x16xf32> to vector<1x8x16xf32>
      %cst_84 = arith.constant dense<0.000000e+00> : vector<1xf32>
      %126 = vector.multi_reduction <add>, %125, %cst_84 [1, 2] : vector<1x8x16xf32> to vector<1xf32>
      %127 = vector.shape_cast %126 : vector<1xf32> to vector<1x1x1xf32>
      %128 = vector.extract %127[0, 0, 0] : f32 from vector<1x1x1xf32>
      %129 = vector.broadcast %128 : f32 to vector<1x1xf32>
      %c0_85 = arith.constant 0 : index
      %c1_86 = arith.constant 1 : index
      %c0_87 = arith.constant 0 : index
      %130 = vector.load %arg4[%c0_85, %c1_86, %c0_87] : memref<1x2x3xf32, #tpu.memory_space<vmem>>, vector<1x1x1xf32>
      %131 = vector.shape_cast %130 : vector<1x1x1xf32> to vector<1x1xf32>
      %132 = vector.shape_cast %129 : vector<1x1xf32> to vector<1x1x1xf32>
      tpu.vector_store %arg4[%c0_85, %c1_86, %c0_87], %132 {strides = array<i32>} : memref<1x2x3xf32, #tpu.memory_space<vmem>>, vector<1x1x1xf32>,
      %c4_88 = arith.constant 4 : index
      %c0_89 = arith.constant 0 : index
      %c0_90 = arith.constant 0 : index
      %133 = vector.load %arg5[%c4_88, %c0_89, %c0_90] : memref<6x8x16xf32, #tpu.memory_space<vmem>>, vector<1x8x16xf32>
      %134 = vector.shape_cast %133 : vector<1x8x16xf32> to vector<8x16xf32>
      %135 = vector.shape_cast %134 : vector<8x16xf32> to vector<1x8x16xf32>
      %cst_91 = arith.constant dense<0.000000e+00> : vector<1xf32>
      %136 = vector.multi_reduction <add>, %135, %cst_91 [1, 2] : vector<1x8x16xf32> to vector<1xf32>
      %137 = vector.shape_cast %136 : vector<1xf32> to vector<1x1x1xf32>
      %138 = vector.extract %137[0, 0, 0] : f32 from vector<1x1x1xf32>
      %139 = vector.broadcast %138 : f32 to vector<1x1xf32>
      %c0_92 = arith.constant 0 : index
      %c1_93 = arith.constant 1 : index
      %c1_94 = arith.constant 1 : index
      %140 = vector.load %arg4[%c0_92, %c1_93, %c1_94] : memref<1x2x3xf32, #tpu.memory_space<vmem>>, vector<1x1x1xf32>
      %141 = vector.shape_cast %140 : vector<1x1x1xf32> to vector<1x1xf32>
      %142 = vector.shape_cast %139 : vector<1x1xf32> to vector<1x1x1xf32>
      tpu.vector_store %arg4[%c0_92, %c1_93, %c1_94], %142 {strides = array<i32>} : memref<1x2x3xf32, #tpu.memory_space<vmem>>, vector<1x1x1xf32>,
      %c5_95 = arith.constant 5 : index
      %c0_96 = arith.constant 0 : index
      %c0_97 = arith.constant 0 : index
      %143 = vector.load %arg5[%c5_95, %c0_96, %c0_97] : memref<6x8x16xf32, #tpu.memory_space<vmem>>, vector<1x8x16xf32>
      %144 = vector.shape_cast %143 : vector<1x8x16xf32> to vector<8x16xf32>
      %145 = vector.shape_cast %144 : vector<8x16xf32> to vector<1x8x16xf32>
      %cst_98 = arith.constant dense<0.000000e+00> : vector<1xf32>
      %146 = vector.multi_reduction <add>, %145, %cst_98 [1, 2] : vector<1x8x16xf32> to vector<1xf32>
      %147 = vector.shape_cast %146 : vector<1xf32> to vector<1x1x1xf32>
      %148 = vector.extract %147[0, 0, 0] : f32 from vector<1x1x1xf32>
      %149 = vector.broadcast %148 : f32 to vector<1x1xf32>
      %c0_99 = arith.constant 0 : index
      %c1_100 = arith.constant 1 : index
      %c2_101 = arith.constant 2 : index
      %150 = vector.load %arg4[%c0_99, %c1_100, %c2_101] : memref<1x2x3xf32, #tpu.memory_space<vmem>>, vector<1x1x1xf32>
      %151 = vector.shape_cast %150 : vector<1x1x1xf32> to vector<1x1xf32>
      %152 = vector.shape_cast %149 : vector<1x1xf32> to vector<1x1x1xf32>
      tpu.vector_store %arg4[%c0_99, %c1_100, %c2_101], %152 {strides = array<i32>} : memref<1x2x3xf32, #tpu.memory_space<vmem>>, vector<1x1x1xf32>,
    } else {
    }
    return
  }
  func.func @transform_0(%arg0: i32, %arg1: i32) -> (i32, i32, i32, i32) {
    %c0_i32 = arith.constant 0 : i32
    %c0_i32_0 = arith.constant 0 : i32
    %c0_i32_1 = arith.constant 0 : i32
    return %arg0, %c0_i32, %arg1, %c0_i32_0 : i32, i32, i32, i32
  }
  func.func @transform_1(%arg0: i32, %arg1: i32) -> (i32, i32, i32) {
    %c0_i32 = arith.constant 0 : i32
    %c0_i32_0 = arith.constant 0 : i32
    return %arg0, %arg1, %c0_i32 : i32, i32, i32
  }
  func.func @transform_2(%arg0: i32, %arg1: i32) -> (i32, i32, i32) {
    %c0_i32 = arith.constant 0 : i32
    %c0_i32_0 = arith.constant 0 : i32
    %c0_i32_1 = arith.constant 0 : i32
    return %arg0, %c0_i32, %c0_i32_0 : i32, i32, i32
  }
}

</mosaic_0001>

<bundles_post_ra>
// kernel: dice_loss_class_reduction.1
= control target key start
LH: loop header
LB: loop body
LE: loop exit
PB: predicated region body
PF: predicated region fallthrough
CT: control target
= control target key end

     0   :  { %7 = vsyncpa [#allocation4], 0  ;;  %s931_s0 = inlined_call_operand.hbm [shape: f32[2,3,16,16], index: 0, kind: input, shape index: {}]   ;;  %s932_s1 = inlined_call_operand.hbm [shape: s32[2,16,16], index: 1, kind: input, shape index: {}]   ;;  %s933_s2 = inlined_call_operand.vmem [shape: f32[2,2,3], index: 2, kind: output, shape index: {}]  }
   0x1   :  { %9 = vsyncpa [#allocation4 + $0x1], 0 }
   0x2   :  { %10 = vsyncpa [#allocation6], 0 }
   0x3   :  { %12 = vsyncpa [#allocation6 + $0x1], 0  ;;  %s773_s9 = smov 0   ;;  %s775_s10 = smov 0  }
   0x4   :  { %s777_s11 = smov 0   ;;  %s779_s12 = smov 0  }
   0x5   :  { %s781_s13 = smov 0   ;;  %s783_s14 = smov 0  }
   0x6 LB: > { %s527_s15 = sadd.s32 4294967295, %s753_s14   ;;  %s30_s16 = sadd.s32 1, %s749_s13  ;;  %s753_s14 = sphi %s783_s14, %s18_s14   ;;  %s749_s13 = sphi %s781_s13, %s940_s13   ;;  %s745_s12 = sphi %s779_s12, %s939_s12   ;;  %s741_s11 = sphi %s777_s11, %s938_s11   ;;  %s737_s10 = sphi %s775_s10, %s937_s10   ;;  %s733_s9 = sphi %s773_s9, %s936_s9  }
   0x7   : > { %p32_p0 = scmp.ge.s32.totalorder %s30_s16, 2  ;;  %s39_s17 = sadd.s32 1, %s741_s11 }
   0x8   : > { %p46_p1 = scmp.ne.s32.totalorder %s741_s11, %s737_s10  ;;  %p47_p2 = scmp.eq.s32.totalorder %s753_s14, 0 }
   0x9   : > { %s942_s16 = smov (%p32_p0, %s30_s16), 0  ;;  %p52_p4 = scmp.ne.s32.totalorder %s737_s10, %s733_s9 }
   0xa   : > { %p48_p3 = por %p47_p2, %p46_p1  ;;  %s34_s18 = ssub.s32 %s749_s13, %s942_s16 }
   0xb   : > { %p53_p5 = scmp.eq.s32.totalorder %s527_s15, 0  ;;  %p37_p6 = scmp.eq.s32.totalorder %s34_s18, 0 }
   0xc   : > { %p571_p8 = scmp.lt.s32.totalorder %s753_s14, 2  ;;  %s821_s21 = sand.u32 1, %s741_s11  }
   0xd   : > { %p812_p7 = por %p53_p5, %p52_p4  ;;  %s546_s22 = smul.u32 48, %s749_s13 }
   0xe   : > { %s818_s20 = scalar_select %p37_p6, %s741_s11, %s39_s17  }
   0xf   : > { %s545_s23 = smul.u32 48, %s821_s21  ;;  %s141_s26 = scalar_lea.hbm %s931_s0, %s546_s22 }
  0x10   : > { %p828_p9 = pnand %p571_p8, %p48_p3  ;;  %s142_s28 = sshll.u32 %s141_s26, 4  ;;  %s143_s28 = int_to_ptr.hbm [resolvable:$true] %s142_s28 }
  0x11   : > { %s134_s29 = scalar_lea.vmem [#allocation3], %s545_s23  ;;  %s131_s3 = scalar_lea.sflag [#allocation4], %s821_s21 }
  0x12   : > { %s144_s30 = sshll.u32 %s134_s29, 4  ;;  %s755_s4 = smov 128   ;;  %s145_s30 = int_to_ptr.vmem [resolvable:$true] %s144_s30 }
  0x13   : > { %s756_s5 = smov 8   ;;  %p535_p10 = scmp.ge.s32.totalorder %s753_s14, 1 }
  0x14   : > { %567 = dma.hbm_to_vmem [thread:$0]  (!%p828_p9), %s143_s28, 768, %s145_s30, %s131_s3, %s755_s4, %s755_s4, %s756_s5  }
  0x15   : > { %p176_p11 = scmp.lt.s32.totalorder %s753_s14, 3  ;;  %s532_s6 = sshll.u32 %s821_s21, 4 }
  0x16   : > { %s544_s7 = sshll.u32 %s749_s13, 4  ;;  %s158_s8 = scalar_lea.vmem [#allocation5], %s532_s6 }
  0x17   : > { %p177_p12 = pnand %p535_p10, %p176_p11  ;;  %s168_s9 = sshll.u32 %s158_s8, 4  ;;  %s169_s9 = int_to_ptr.vmem [resolvable:$true] %s168_s9 }
  0x18   : > { %s165_s18 = scalar_lea.hbm %s932_s1, %s544_s7  ;;  %s155_s23 = scalar_lea.sflag [#allocation6], %s821_s21 }
  0x19   : > { %s166_s22 = sshll.u32 %s165_s18, 4  ;;  %180 = sbr.rel (%p177_p12) target bundleno = 282 (0x11a), region = 28  ;;  %s167_s22 = int_to_ptr.hbm [resolvable:$true] %s166_s22 }
  0x1a   : > { %570 = dma.hbm_to_vmem [thread:$0]  (!%p828_p9), %s167_s22, 256, %s169_s9, %s155_s23, %s755_s4, %s755_s4, %s756_s5  }
  0x1b   : > { %s182_s24 = sand.u32 (!%p177_p12), 1, %s737_s10  }
  0x1c   : > { %s547_s25 = smul.u32 (!%p177_p12), 48, %s182_s24  ;;  %s183_s26 = scalar_lea.sflag (!%p177_p12), [#allocation4], %s182_s24 }
  0x1e   : > { %s186_s28 = scalar_lea.vmem [#allocation3], %s547_s25 }
  0x1f   : > { %724 = dma.done.wait (%p812_p7), %s183_s26, 768  }
  0x20   : > { %726 = vsyncadd (%p812_p7), %s183_s26, 4294966528  ;;  %s536_s29 = sshll.u32 %s182_s24, 4  ;;  %s193_s30 = scalar_lea.sflag [#allocation6], %s182_s24 }
  0x21   : > { %s196_s3 = scalar_lea.vmem [#allocation5], %s536_s29 }
  0x22   : > { %728 = dma.done.wait (%p812_p7), %s193_s30, 256  }
  0x23   : > { %730 = vsyncadd (%p812_p7), %s193_s30, 4294967040  ;;  %vm232_vm0 = vcmask 130048   ;;  %v757_v0 = vmov 0.0   ;;  %v860_v1 = vld [vmem:[%s196_s3] sm:$0xff]  ;;  %v862_v2 = vld [vmem:[%s196_s3 + $0x8] sm:$0xff]  ;;  %p224_p13 = scmp.lt.s32.totalorder %s745_s12, 1 }
  0x24   : > { %235 = vst.msk [vmem:[#allocation2 + $0x10] sm:$0xff] %vm232_vm0, %v757_v0  ;;  %vm287_vm1 = vcmp.eq.s32.totalorder %v860_v1, 1  ;;  %vm288_vm2 = vcmp.eq.s32.totalorder %v862_v2, 1  ;;  %v239_v3 = vld [vmem:[%s186_s28] sm:$0xff]  ;;  %v240_v4 = vld [vmem:[%s186_s28 + $0x8] sm:$0xff]  ;;  %v538_v5 = vld [vmem:[%s186_s28 + $0x10] sm:$0xff] }
  0x25   : > { %233 = vst.msk [vmem:[#allocation2] sm:$0xff] %vm232_vm0, %v757_v0  ;;  %v307_v6 = vsel %vm287_vm1, 1.0, %v757_v0  ;;  %v308_v7 = vsel %vm288_vm2, 1.0, %v757_v0  ;;  %v539_v8 = vld [vmem:[%s186_s28 + $0x18] sm:$0xff]  ;;  %v540_v9 = vld [vmem:[%s186_s28 + $0x20] sm:$0xff]  ;;  %v541_v10 = vld [vmem:[%s186_s28 + $0x28] sm:$0xff] }
  0x26   : > { %234 = vst.msk [vmem:[#allocation2 + $0x8] sm:$0xff] %vm232_vm0, %v757_v0  ;;  %v311_v12 = vsel %vm232_vm0, %v307_v6, 0.0  ;;  %v312_v13 = vsel %vm232_vm0, %v308_v7, 0.0  ;;  %v249_v14 = vmax.f32 %v538_v5, %v540_v9  ;;  %v250_v15 = vmax.f32 %v539_v8, %v541_v10  ;;  %s944_s12 = smov (!%p224_p13, %s745_s12), 1 }
  0x27   : > { %236 = vst.msk [vmem:[#allocation2 + $0x18] sm:$0xff] %vm232_vm0, %v757_v0  ;;  %v313_v16 = vadd.f32 %v312_v13, %v311_v12  ;;  %vm289_vm3 = vcmp.eq.s32.totalorder %v860_v1, 2  ;;  %vm290_vm4 = vcmp.eq.s32.totalorder %v862_v2, 2  ;;  %s537_s19 = sshll.u32 %s944_s12, 1  ;;  %vm356_vm5 = vcmask 0  }
  0x28   : > { %237 = vst.msk [vmem:[#allocation2 + $0x20] sm:$0xff] %vm232_vm0, %v757_v0  ;;  %v251_v17 = vmax.f32 %v239_v3, %v249_v14  ;;  %v252_v18 = vmax.f32 %v240_v4, %v250_v15  ;;  %v332_v33 = vsel %vm289_vm3, 1.0, %v757_v0  ;;  %v333_v34 = vsel %vm290_vm4, 1.0, %v757_v0  ;;  %s227_s4 = scalar_lea.vmem %s933_s2, %s537_s19 }
  0x29   : > { %238 = vst.msk [vmem:[#allocation2 + $0x28] sm:$0xff] %vm232_vm0, %v757_v0  ;;  %v336_v36 = vsel %vm232_vm0, %v332_v33, 0.0  ;;  %v337_v37 = vsel %vm232_vm0, %v333_v34, 0.0  ;;  %vm370_vm6 = vcmask 8200   ;;  %vm384_vm7 = vcmask 16400  }
  0x2a   : > { %v253_v20 = vsub.f32 %v239_v3, %v251_v17  ;;  %v254_v21 = vsub.f32 %v240_v4, %v252_v18  ;;  %v259_v22 = vsub.f32 %v538_v5, %v251_v17  ;;  %v260_v23 = vsub.f32 %v539_v8, %v252_v18 }
  0x2b   : > { %v310_v11 = vld [vmem:[#allocation2 + $0x10] sm:$0xff]  ;;  %v265_v24 = vsub.f32 %v540_v9, %v251_v17  ;;  %v266_v25 = vsub.f32 %v541_v10, %v252_v18  ;;  %v338_v39 = vadd.f32 %v337_v37, %v336_v36 }
  0x2c   : > { %v314_v19 = vadd.f32 %v313_v16, %v310_v11  ;;  %v255_v26 = vmul.f32 1.442695, %v253_v20  ;;  %v257_v27 = vmul.f32 1.442695, %v254_v21  ;;  %v261_v28 = vmul.f32 1.442695, %v259_v22 }
  0x2d   : > { %v263_v29 = vmul.f32 1.442695, %v260_v23  ;;  %v267_v30 = vmul.f32 1.442695, %v265_v24  ;;  %v269_v31 = vmul.f32 1.442695, %v266_v25 }
  0x2e   : > { %315 = vst.msk [vmem:[#allocation2 + $0x10] sm:$0xff] %vm232_vm0, %v314_v19  ;;  %623 = vpow2.f32 %v255_v26  ;;  %v293_v11 = vld [vmem:[#allocation2] sm:$0xff]  ;;  %v319_v13 = vld [vmem:[#allocation2 + $0x18] sm:$0xff]  ;;  %v301_v17 = vld [vmem:[#allocation2 + $0x8] sm:$0xff] }
  0x2f   : > { %625 = vpow2.f32 %v257_v27  ;;  %v326_v5 = vld [vmem:[#allocation2 + $0x20] sm:$0xff] }
  0x30   : > { %627 = vpow2.f32 %v261_v28  ;;  %v335_v41 = vld [vmem:[#allocation2 + $0x28] sm:$0xff] }
  0x31   : > { %629 = vpow2.f32 %v263_v29  ;;  %v339_v43 = vadd.f32 %v338_v39, %v335_v41 }
  0x32   : > { %631 = vpow2.f32 %v267_v30 }
  0x33   : > { %633 = vpow2.f32 %v269_v31  ;;  %340 = vst.msk [vmem:[#allocation2 + $0x28] sm:$0xff] %vm232_vm0, %v339_v43 }
  0x34   : > { %v624_v38 = vpop.eup %623 }
  0x35   : > { %v372_v32 = vld [vmem:[#allocation2 + $0x10] sm:$0xff]  ;;  %v626_v40 = vpop.eup %625 }
  0x36   : > { %v373_v35 = vsel %vm232_vm0, %v372_v32, 0.0  ;;  %v628_v42 = vpop.eup %627 }
  0x37   : > { %374 = vadd.xlane.f32.xlu1 %v373_v35  ;;  %v630_v44 = vpop.eup %629  ;;  %v271_v45 = vadd.f32 %v628_v42, %v624_v38 }
  0x38   : > { %v632_v46 = vpop.eup %631  ;;  %v272_v47 = vadd.f32 %v630_v44, %v626_v40 }
  0x39   : > { %v634_v48 = vpop.eup %633  ;;  %v273_v49 = vadd.f32 %v632_v46, %v271_v45 }
  0x3a   : > { %v274_v50 = vadd.f32 %v634_v48, %v272_v47  ;;  %v412_v29 = vld [vmem:[#allocation2 + $0x28] sm:$0xff] }
  0x3b   : > { %635 = vrcp.f32 %v273_v49  ;;  %v413_v31 = vsel %vm232_vm0, %v412_v29, 0.0 }
  0x3c   : > { %637 = vrcp.f32 %v274_v50 }
  0x41   : > { %v636_v51 = vpop.eup %635 }
  0x42   : > { %v638_v52 = vpop.eup %637  ;;  %v277_v53 = vmul.f32 %v636_v51, %v273_v49 }
  0x43   : > { %v278_v54 = vmul.f32 %v638_v52, %v274_v50 }
  0x44   : > { %v279_v55 = vsub.f32 2.0, %v277_v53 }
  0x45   : > { %v280_v56 = vsub.f32 2.0, %v278_v54 }
  0x46   : > { %v281_v57 = vmul.f32 %v636_v51, %v279_v55 }
  0x47   : > { %v282_v58 = vmul.f32 %v638_v52, %v280_v56 }
  0x48   : > { %v285_v59 = vmul.f32 %v632_v46, %v281_v57  ;;  %v283_v60 = vmul.f32 %v628_v42, %v281_v57 }
  0x49   : > { %v286_v61 = vmul.f32 %v634_v48, %v282_v58  ;;  %v284_v62 = vmul.f32 %v630_v44, %v282_v58 }
  0x4a   : > { %v327_v63 = vsel %vm232_vm0, %v285_v59, 0.0  ;;  %v291_v0 = vsel %vm287_vm1, %v283_v60, 0.0  ;;  %v316_v3 = vsel %vm289_vm3, %v285_v59, 0.0  ;;  %v302_v4 = vsel %vm232_vm0, %v283_v60, 0.0 }
  0x4b   : > { %v328_v6 = vsel %vm232_vm0, %v286_v61, 0.0  ;;  %v292_v7 = vsel %vm288_vm2, %v284_v62, 0.0  ;;  %v295_v8 = vsel %vm232_vm0, %v291_v0, 0.0  ;;  %v317_v9 = vsel %vm290_vm4, %v286_v61, 0.0 }
  0x4c   : > { %v329_v10 = vadd.f32 %v328_v6, %v327_v63  ;;  %v296_v12 = vsel %vm232_vm0, %v292_v7, 0.0  ;;  %v320_v1 = vsel %vm232_vm0, %v316_v3, 0.0  ;;  %v321_v14 = vsel %vm232_vm0, %v317_v9, 0.0 }
  0x4d   : > { %v297_v15 = vadd.f32 %v296_v12, %v295_v8  ;;  %v322_v16 = vadd.f32 %v321_v14, %v320_v1  ;;  %v303_v18 = vsel %vm232_vm0, %v284_v62, 0.0 }
  0x4e   : > { %v330_v19 = vadd.f32 %v329_v10, %v326_v5  ;;  %v304_v20 = vadd.f32 %v303_v18, %v302_v4 }
  0x4f   : > { %v298_v21 = vadd.f32 %v297_v15, %v293_v11  ;;  %v323_v22 = vadd.f32 %v322_v16, %v319_v13 }
  0x50   : > { %331 = vst.msk [vmem:[#allocation2 + $0x20] sm:$0xff] %vm232_vm0, %v330_v19  ;;  %v305_v2 = vadd.f32 %v304_v20, %v301_v17 }
  0x51   : > { %299 = vst.msk [vmem:[#allocation2] sm:$0xff] %vm232_vm0, %v298_v21 }
  0x52   : > { %324 = vst.msk [vmem:[#allocation2 + $0x18] sm:$0xff] %vm232_vm0, %v323_v22 }
  0x53   : > { %306 = vst.msk [vmem:[#allocation2 + $0x8] sm:$0xff] %vm232_vm0, %v305_v2 }
  0x57   : > { %v399_v23 = vld [vmem:[#allocation2 + $0x20] sm:$0xff] }
  0x58   : > { %v400_v24 = vsel %vm232_vm0, %v399_v23, 0.0  ;;  %v344_v25 = vld [vmem:[#allocation2] sm:$0xff] }
  0x59   : > { %401 = vadd.xlane.f32.xlu2 %v400_v24  ;;  %v345_v26 = vsel %vm232_vm0, %v344_v25, 0.0  ;;  %v386_v27 = vld [vmem:[#allocation2 + $0x18] sm:$0xff] }
  0x5a   : > { %346 = vadd.xlane.f32.xlu0 %v345_v26  ;;  %v387_v28 = vsel %vm232_vm0, %v386_v27, 0.0  ;;  %v358_v30 = vld [vmem:[#allocation2 + $0x8] sm:$0xff] }
  0x5b   : > { %388 = vadd.xlane.f32.xlu1 %v387_v28  ;;  %v359_v32 = vsel %vm232_vm0, %v358_v30, 0.0 }
  0x61   : > { %414 = vadd.xlane.f32.xlu2 %v413_v31 }
  0x62   : > { %360 = vadd.xlane.f32.xlu0 %v359_v32 }
  0xaa   : > { %v375_v33 = vpop.xlane.xlu1 %374 }
  0xab   : > { %v376_v35 = vrot.slane %v375_v33, 4 }
  0xad   : > { %v377_v42 = vadd.f32 %v376_v35, %v375_v33 }
  0xaf   : > { %v378_v48 = vrot.slane %v377_v42, 2 }
  0xb1   : > { %v379_v59 = vadd.f32 %v378_v48, %v377_v42 }
  0xb3   : > { %v380_v3 = vrot.slane %v379_v59, 1 }
  0xb5   : > { %v381_v9 = vadd.f32 %v380_v3, %v379_v59 }
  0xcc   : > { %v402_v34 = vpop.xlane.xlu2 %401 }
  0xcd   : > { %v347_v36 = vpop.xlane.xlu0 %346  ;;  %v403_v39 = vrot.slane %v402_v34, 4 }
  0xce   : > { %v348_v37 = vrot.slane %v347_v36, 4  ;;  %v389_v38 = vpop.xlane.xlu1 %388 }
  0xcf   : > { %v390_v40 = vrot.slane %v389_v38, 4  ;;  %v404_v45 = vadd.f32 %v403_v39, %v402_v34 }
  0xd0   : > { %v349_v41 = vadd.f32 %v348_v37, %v347_v36 }
  0xd1   : > { %v391_v44 = vadd.f32 %v390_v40, %v389_v38  ;;  %v405_v54 = vrot.slane %v404_v45, 2 }
  0xd2   : > { %v350_v43 = vrot.slane %v349_v41, 2 }
  0xd3   : > { %v392_v51 = vrot.slane %v391_v44, 2  ;;  %v406_v63 = vadd.f32 %v405_v54, %v404_v45 }
  0xd4   : > { %v415_v46 = vpop.xlane.xlu2 %414  ;;  %v351_v47 = vadd.f32 %v350_v43, %v349_v41 }
  0xd5   : > { %v416_v49 = vrot.slane %v415_v46, 4  ;;  %v361_v50 = vpop.xlane.xlu0 %360  ;;  %v393_v60 = vadd.f32 %v392_v51, %v391_v44  ;;  %v407_v7 = vrot.slane %v406_v63, 1 }
  0xd6   : > { %v362_v52 = vrot.slane %v361_v50, 4  ;;  %v352_v53 = vrot.slane %v351_v47, 1 }
  0xd7   : > { %v417_v55 = vadd.f32 %v416_v49, %v415_v46  ;;  %v394_v5 = vrot.slane %v393_v60, 1  ;;  %v408_v12 = vadd.f32 %v407_v7, %v406_v63 }
  0xd8   : > { %v363_v56 = vadd.f32 %v362_v52, %v361_v50  ;;  %v353_v57 = vadd.f32 %v352_v53, %v351_v47 }
  0xd9   : > { %v418_v58 = vrot.slane %v417_v55, 2  ;;  %v395_v10 = vadd.f32 %v394_v5, %v393_v60 }
  0xda   : > { %v364_v61 = vrot.slane %v363_v56, 2  ;;  %548 = vpush %v353_v57 }
  0xdb   : > { %v419_v62 = vadd.f32 %v418_v58, %v417_v55 }
  0xdc   : > { %v365_v0 = vadd.f32 %v364_v61, %v363_v56 }
  0xdd   : > { %v420_v6 = vrot.slane %v419_v62, 1 }
  0xde   : > { %v366_v4 = vrot.slane %v365_v0, 1 }
  0xdf   : > { %v421_v11 = vadd.f32 %v420_v6, %v419_v62 }
  0xe0   : > { %v367_v8 = vadd.f32 %v366_v4, %v365_v0 }
  0xe2   : > { %550 = vpush %v367_v8 }
  0xe3   : > { %552 = vpush %v381_v9 }
  0xe4   : > { %554 = vpush %v395_v10 }
  0xe5   : > { %556 = vpush %v408_v12 }
  0xe6   : > { %558 = vpush %v421_v11 }
 0x10b   : > { %s549_s5 = spop %548 }
 0x10c   : > { %v355_v13 = vstv %s549_s5 }
 0x10d   : > { %357 = vst.msk [vmem:[%s227_s4] sm:$0x1] %vm356_vm5, %v355_v13 }
 0x113   : > { %s551_s6 = spop %550 }
 0x114   : > { %v369_v1 = vstv %s551_s6  ;;  %s553_s7 = spop %552 }
 0x115   : > { %371 = vst.msk [vmem:[%s227_s4] sm:$0x1] %vm370_vm6, %v369_v1  ;;  %v383_v14 = vstv %s553_s7  ;;  %s555_s8 = spop %554 }
 0x116   : > { %385 = vst.msk [vmem:[%s227_s4] sm:$0x1] %vm384_vm7, %v383_v14  ;;  %v397_v15 = vstv %s555_s8  ;;  %s557_s9 = spop %556 }
 0x117   : > { %398 = vst.msk [vmem:[%s227_s4 + $0x1] sm:$0x1] %vm356_vm5, %v397_v15  ;;  %v410_v16 = vstv %s557_s9  ;;  %s559_s12 = spop %558 }
 0x118   : > { %411 = vst.msk [vmem:[%s227_s4 + $0x1] sm:$0x1] %vm370_vm6, %v410_v16  ;;  %v423_v17 = vstv %s559_s12 }
 0x119   : > { %424 = vst.msk [vmem:[%s227_s4 + $0x1] sm:$0x1] %vm384_vm7, %v423_v17 }
 0x11a PF: > { %s18_s14 = sadd.s32 1, %s753_s14   ;;  %s936_s9 = smov %s737_s10 }
 0x11b   : > { %p15_p0 = scmp.ge.s32.totalorder %s18_s14, 4   ;;  %s937_s10 = smov %s741_s11 }
 0x11c   : > { %s938_s11 = smov %s818_s20  ;;  %s939_s12 = smov %s749_s13 }
 0x11d   : > { %s940_s13 = smov %s942_s16  ;;  %17 = sbr.rel (!%p15_p0) target bundleno = 6 (0x6), region = 96 }
 0x122   :  { %444 = vsyncpa [#allocation4], 1 }
 0x123   :  { %446 = vsyncpa [#allocation4 + $0x1], 1 }
 0x124   :  { %447 = vsyncpa [#allocation6], 1 }
 0x125   :  { %449 = vsyncpa [#allocation6 + $0x1], 1 }

</bundles_post_ra>
